<compile_context>
chip_gen: v7x
topology: tpu7x:2x2x1
jax: 0.10.0
libtpu: 0.0.40
codegen_flags: <defaults>
</compile_context>

<pallas_src>
import functools
import math

import jax
import jax.numpy as jnp
from jax.experimental import pallas as pl
from jax.experimental.pallas import tpu as pltpu


def _round_up(x, k):
    return ((x + k - 1) // k) * k


def _arc_kernel(feature_ref, w_ref, out_ref, *, m, s, n_pad_cols, f):
    # Cast after the VMEM load (keeps HBM traffic at the input dtype width).
    x = feature_ref[...].astype(jnp.float32)       # (TILE_N, F)
    w = w_ref[...]                                  # (F, C_pad) f32, unit columns

    # F.normalize(feature, dim=1)  (eps = 1e-12, matching torch)
    x_norm = jnp.sqrt(jnp.sum(x * x, axis=1, keepdims=True))
    x = x / jnp.maximum(x_norm, 1e-12)

    # cos = (x @ w) / 10  ->  values in [-0.1, 0.1]
    if f <= 8:
        # Tiny contraction: broadcast-FMAs on the VPU, skip the MXU entirely.
        cos = x[:, 0:1] * w[0:1, :]
        for k in range(1, f):
            cos = cos + x[:, k:k + 1] * w[k:k + 1, :]
        cos = cos * 0.1
    else:
        lhs, rhs = x, w
        if f >= 128:
            lhs, rhs = x.astype(jnp.bfloat16), w.astype(jnp.bfloat16)
        cos = jnp.dot(lhs, rhs, preferred_element_type=jnp.float32) * 0.1

    # a = acos(cos); cos(a) == cos; sin(a) = sqrt(1 - cos^2) since a in [0, pi].
    # |cos| <= 0.1 (the /10 scaling), so a 3-term series in u = cos^2 is exact
    # to < 1e-9 and avoids an EUP sqrt:
    #   sqrt(1 - u) = 1 - u/2 - u^2/8 - u^3/16 - O(u^4)
    u = cos * cos
    sin_a = 1.0 - u * (0.5 + u * (0.125 + u * 0.0625))
    # cos(a + m) = cos*cos(m) - sin(a)*sin(m)  (no acos / cos transcendentals).
    cos_am = cos * math.cos(m) - sin_a * math.sin(m)

    e = jnp.exp(s * cos)                            # exp(s * cos(a))
    # Zero-padded W columns produce cos = 0 -> exp(0) = 1 each; remove their
    # contribution from the row sum so real-class denominators stay exact.
    row_sum = jnp.sum(e, axis=1, keepdims=True) - float(n_pad_cols)
    down = row_sum - e                              # (TILE_N, C_pad)

    top_log = s * cos_am                            # log(top) directly
    top = jnp.exp(top_log)
    # log(top / (top + down)) = log(top) - log(top + down)
    out_ref[...] = (top_log - jnp.log(top + down)).astype(out_ref.dtype)


def arc_forward(feature, W, *, m=1.0, s=10.0, out_dtype=jnp.float32):
    """feature: (N, F), W: (F, C) -> (N, C) out_dtype (forward of the Arc module)."""
    n, f = feature.shape
    f2, c = W.shape
    assert f == f2, (feature.shape, W.shape)

    # ---- W prep hoisted out of the kernel (tiny (F, C) array, reused grid x) ----
    w = W.astype(jnp.float32)
    w = w / jnp.maximum(jnp.sqrt(jnp.sum(w * w, axis=0, keepdims=True)), 1e-12)
    c_pad = _round_up(c, 128)            # lane-dense output stores / DMA
    n_pad_cols = c_pad - c
    if n_pad_cols:
        w = jnp.pad(w, ((0, 0), (0, n_pad_cols)))   # zero cols -> cos = 0

    # ---- VMEM-aware row-tile size ----
    in_bytes = feature.dtype.itemsize
    out_bytes = jnp.dtype(out_dtype).itemsize
    vmem_limit = 32 << 20                # raised/explicit; safe on v5e/v6e/v7x
    budget = int(0.6 * vmem_limit)
    # per-row live bytes: ~6 f32 (tile, C_pad) temporaries + 2x double-buffered
    # output block + 2x double-buffered feature block.
    per_row = c_pad * (6 * 4 + 2 * out_bytes) + 2 * f * in_bytes
    tile_n = max(8, min(2048, (budget // per_row) // 8 * 8))
    tile_n = int(min(tile_n, _round_up(n, 8)))
    # Guarantee >= 2 grid steps when possible so v7x can shard the "parallel"
    # axis across its 2 TensorCores (neutral on v5e/v6e).
    if _round_up(n, tile_n) == tile_n and n > 8:
        tile_n = _round_up((n + 1) // 2, 8)
    n_pad = _round_up(n, tile_n)
    if n_pad != n:
        feature = jnp.pad(feature, ((0, n_pad - n), (0, 0)))

    grid = (n_pad // tile_n,)
    kernel = functools.partial(
        _arc_kernel, m=float(m), s=float(s), n_pad_cols=n_pad_cols, f=f)

    out = pl.pallas_call(
        kernel,
        out_shape=jax.ShapeDtypeStruct((n_pad, c_pad), out_dtype),
        grid=grid,
        in_specs=[
            pl.BlockSpec((tile_n, f), lambda i: (i, 0)),   # row tile of features
            pl.BlockSpec((f, c_pad), lambda i: (0, 0)),    # whole W, stays resident
        ],
        out_specs=pl.BlockSpec((tile_n, c_pad), lambda i: (i, 0)),
        compiler_params=pltpu.CompilerParams(
            dimension_semantics=("parallel",),             # independent row blocks
            vmem_limit_bytes=vmem_limit,
        ),
    )(feature, w)
    return out[:n, :c]


def _reference(feature, W, m=1.0, s=10.0):
    """Pure-JAX transcription of the PyTorch Arc.forward."""
    x = feature / jnp.maximum(
        jnp.linalg.norm(feature, axis=1, keepdims=True), 1e-12)
    w = W / jnp.maximum(jnp.linalg.norm(W, axis=0, keepdims=True), 1e-12)
    cos = jnp.matmul(x, w) / 10.0
    a = jnp.arccos(cos)
    top = jnp.exp(s * jnp.cos(a + m))
    e = jnp.exp(s * jnp.cos(a))
    down = jnp.sum(e, axis=1, keepdims=True) - e
    return jnp.log(top / (top + down))


if __name__ == "__main__":
    key = jax.random.PRNGKey(0)
    k1, k2 = jax.random.split(key)

    # Module defaults: feature_dim=2, cls_dim=10; small batch for the test.
    N, F_DIM, C_DIM = 16, 2, 10
    feature = jax.random.normal(k1, (N, F_DIM), dtype=jnp.float32)
    W = jax.random.normal(k2, (F_DIM, C_DIM), dtype=jnp.float32)

    out = arc_forward(feature, W, m=1.0, s=10.0)
    out = jax.block_until_ready(out)

    ref = _reference(feature, W, m=1.0, s=10.0)
    assert out.shape == ref.shape, (out.shape, ref.shape)
    assert jnp.allclose(out, ref, rtol=1e-4, atol=1e-5), (out, ref)
    print("KERNEL_OK")
</pallas_src>

<mosaic_0001>
module attributes {stable_mosaic.version = 11 : i64} {
  func.func @_arc_kernel(%arg0: i32, %arg1: memref<8x2xf32, #tpu.memory_space<vmem>>, %arg2: memref<2x128xf32, #tpu.memory_space<vmem>>, %arg3: memref<8x128xf32, #tpu.memory_space<vmem>>) attributes {dimension_semantics = [#tpu.dimension_semantics<parallel>], iteration_bounds = array<i64: 2>, scalar_prefetch = 0 : i64, scratch_operands = 0 : i64, tpu.core_type = #tpu.core_type<tc>, window_params = [{transform_indices = @transform_0, window_bounds = array<i64: 8, 2>}, {pipeline_mode = #tpu.pipeline_mode<synchronous>, transform_indices = @transform_1, window_bounds = array<i64: 2, 128>}, {transform_indices = @transform_2, window_bounds = array<i64: 8, 128>}]} {
    %c0 = arith.constant 0 : index
    %c0_0 = arith.constant 0 : index
    %0 = vector.load %arg1[%c0, %c0_0] : memref<8x2xf32, #tpu.memory_space<vmem>>, vector<8x2xf32>
    %c0_1 = arith.constant 0 : index
    %c0_2 = arith.constant 0 : index
    %1 = vector.load %arg2[%c0_1, %c0_2] : memref<2x128xf32, #tpu.memory_space<vmem>>, vector<2x128xf32>
    %2 = arith.mulf %0, %0 : vector<8x2xf32>
    %cst = arith.constant dense<0.000000e+00> : vector<8xf32>
    %3 = vector.multi_reduction <add>, %2, %cst [1] : vector<8x2xf32> to vector<8xf32>
    %4 = vector.shape_cast %3 : vector<8xf32> to vector<8x1xf32>
    %5 = math.sqrt %4 : vector<8x1xf32>
    %cst_3 = arith.constant 9.99999996E-13 : f32
    %6 = vector.broadcast %cst_3 : f32 to vector<8x1xf32>
    %7 = arith.maximumf %5, %6 : vector<8x1xf32>
    %8 = vector.broadcast %7 : vector<8x1xf32> to vector<8x2xf32>
    %9 = arith.divf %0, %8 : vector<8x2xf32>
    %10 = vector.extract_strided_slice %9 {offsets = [0, 0], sizes = [8, 1], strides = [1, 1]} : vector<8x2xf32> to vector<8x1xf32>
    %11 = vector.extract_strided_slice %1 {offsets = [0, 0], sizes = [1, 128], strides = [1, 1]} : vector<2x128xf32> to vector<1x128xf32>
    %12 = vector.broadcast %10 : vector<8x1xf32> to vector<8x128xf32>
    %13 = vector.broadcast %11 : vector<1x128xf32> to vector<8x128xf32>
    %14 = arith.mulf %12, %13 : vector<8x128xf32>
    %15 = vector.extract_strided_slice %9 {offsets = [0, 1], sizes = [8, 1], strides = [1, 1]} : vector<8x2xf32> to vector<8x1xf32>
    %16 = vector.extract_strided_slice %1 {offsets = [1, 0], sizes = [1, 128], strides = [1, 1]} : vector<2x128xf32> to vector<1x128xf32>
    %17 = vector.broadcast %15 : vector<8x1xf32> to vector<8x128xf32>
    %18 = vector.broadcast %16 : vector<1x128xf32> to vector<8x128xf32>
    %19 = arith.mulf %17, %18 : vector<8x128xf32>
    %20 = arith.addf %14, %19 : vector<8x128xf32>
    %cst_4 = arith.constant 1.000000e-01 : f32
    %21 = vector.broadcast %cst_4 : f32 to vector<8x128xf32>
    %22 = arith.mulf %20, %21 : vector<8x128xf32>
    %23 = arith.mulf %22, %22 : vector<8x128xf32>
    %cst_5 = arith.constant 6.250000e-02 : f32
    %24 = vector.broadcast %cst_5 : f32 to vector<8x128xf32>
    %25 = arith.mulf %23, %24 : vector<8x128xf32>
    %cst_6 = arith.constant 1.250000e-01 : f32
    %26 = vector.broadcast %cst_6 : f32 to vector<8x128xf32>
    %27 = arith.addf %26, %25 : vector<8x128xf32>
    %28 = arith.mulf %23, %27 : vector<8x128xf32>
    %cst_7 = arith.constant 5.000000e-01 : f32
    %29 = vector.broadcast %cst_7 : f32 to vector<8x128xf32>
    %30 = arith.addf %29, %28 : vector<8x128xf32>
    %31 = arith.mulf %23, %30 : vector<8x128xf32>
    %cst_8 = arith.constant 1.000000e+00 : f32
    %32 = vector.broadcast %cst_8 : f32 to vector<8x128xf32>
    %33 = arith.subf %32, %31 : vector<8x128xf32>
    %cst_9 = arith.constant 0.540302277 : f32
    %34 = vector.broadcast %cst_9 : f32 to vector<8x128xf32>
    %35 = arith.mulf %22, %34 : vector<8x128xf32>
    %cst_10 = arith.constant 0.841470957 : f32
    %36 = vector.broadcast %cst_10 : f32 to vector<8x128xf32>
    %37 = arith.mulf %33, %36 : vector<8x128xf32>
    %38 = arith.subf %35, %37 : vector<8x128xf32>
    %cst_11 = arith.constant 1.000000e+01 : f32
    %39 = vector.broadcast %cst_11 : f32 to vector<8x128xf32>
    %40 = arith.mulf %39, %22 : vector<8x128xf32>
    %41 = math.exp %40 : vector<8x128xf32>
    %cst_12 = arith.constant dense<0.000000e+00> : vector<8xf32>
    %42 = vector.multi_reduction <add>, %41, %cst_12 [1] : vector<8x128xf32> to vector<8xf32>
    %43 = vector.shape_cast %42 : vector<8xf32> to vector<8x1xf32>
    %cst_13 = arith.constant 1.180000e+02 : f32
    %44 = vector.broadcast %cst_13 : f32 to vector<8x1xf32>
    %45 = arith.subf %43, %44 : vector<8x1xf32>
    %46 = vector.broadcast %45 : vector<8x1xf32> to vector<8x128xf32>
    %47 = arith.subf %46, %41 : vector<8x128xf32>
    %cst_14 = arith.constant 1.000000e+01 : f32
    %48 = vector.broadcast %cst_14 : f32 to vector<8x128xf32>
    %49 = arith.mulf %48, %38 : vector<8x128xf32>
    %50 = math.exp %49 : vector<8x128xf32>
    %51 = arith.addf %50, %47 : vector<8x128xf32>
    %52 = math.log %51 : vector<8x128xf32>
    %53 = arith.subf %49, %52 : vector<8x128xf32>
    %c0_15 = arith.constant 0 : index
    %c0_16 = arith.constant 0 : index
    %54 = vector.load %arg3[%c0_15, %c0_16] : memref<8x128xf32, #tpu.memory_space<vmem>>, vector<8x128xf32>
    tpu.vector_store %arg3[%c0_15, %c0_16], %53 {strides = array<i32>} : memref<8x128xf32, #tpu.memory_space<vmem>>, vector<8x128xf32>,
    return
  }
  func.func @transform_0(%arg0: i32) -> (i32, i32) {
    %c0_i32 = arith.constant 0 : i32
    %c0_i32_0 = arith.constant 0 : i32
    return %arg0, %c0_i32 : i32, i32
  }
  func.func @transform_1(%arg0: i32) -> (i32, i32) {
    %c0_i32 = arith.constant 0 : i32
    %c0_i32_0 = arith.constant 0 : i32
    %c0_i32_1 = arith.constant 0 : i32
    return %c0_i32, %c0_i32_0 : i32, i32
  }
  func.func @transform_2(%arg0: i32) -> (i32, i32) {
    %c0_i32 = arith.constant 0 : i32
    %c0_i32_0 = arith.constant 0 : i32
    return %arg0, %c0_i32 : i32, i32
  }
}

</mosaic_0001>

<bundles_post_ra>
// kernel: tpu_custom_call.1
= control target key start
LH: loop header
LB: loop body
LE: loop exit
PB: predicated region body
PF: predicated region fallthrough
CT: control target
= control target key end

     0   :  { %7 = vsyncpa [#allocation3], 0  ;;  %s525_s0 = inlined_call_operand.vmem [shape: f32[16,2], index: 0, kind: input, shape index: {}]   ;;  %s526_s1 = inlined_call_operand.vmem [shape: f32[2,128], index: 1, kind: input, shape index: {}]   ;;  %s527_s2 = inlined_call_operand.hbm [shape: f32[16,128], index: 2, kind: output, shape index: {}]  }
   0x1   :  { %9 = vsyncpa [#allocation3 + $0x1], 0  ;;  %s422_s9 = smov 0   ;;  %s424_s10 = smov 0  }
   0x2   :  { %s426_s11 = smov 0   ;;  %s428_s12 = smov 0  }
   0x3 LB: > { %s443_s13 = sadd.s32 4294967295, %s402_s12   ;;  %s275_s14 = sadd.s32 4294967294, %s402_s12   ;;  %s402_s12 = sphi %s428_s12, %s533_s12   ;;  %s398_s11 = sphi %s426_s11, %s532_s11   ;;  %s394_s10 = sphi %s424_s10, %s531_s10   ;;  %s390_s9 = sphi %s422_s9, %s530_s9  }
   0x4   : > { %s447_s15 = sadd.s32 1, %s402_s12   ;;  %s69_s16 = sadd.s32 1, %s398_s11 }
   0x5   : > { %s66_s17 = ssub.s32 %s402_s12, %s447_s15  ;;  %p79_p0 = scmp.ne.s32.totalorder %s398_s11, %s394_s10 }
   0x6   : > { %p67_p1 = scmp.eq.s32.totalorder %s66_s17, 0  ;;  %p80_p2 = scmp.eq.s32.totalorder %s443_s13, 1 }
   0x7   : > { %p85_p3 = scmp.ne.s32.totalorder %s394_s10, %s390_s9  ;;  %p86_p4 = scmp.eq.s32.totalorder %s275_s14, 1 }
   0x8   : > { %s458_s18 = scalar_select %p67_p1, %s398_s11, %s69_s16  }
   0x9   : > { %p460_p5 = por %p80_p2, %p79_p0  ;;  %p464_p6 = por %p86_p4, %p85_p3 }
   0xa   : > { %p278_p7 = scmp.ge.s32.totalorder %s402_s12, 1  ;;  %p114_p8 = scmp.lt.s32.totalorder %s402_s12, 3 }
   0xc   : > { %p115_p9 = pnand %p278_p7, %p114_p8 }
   0xd   : > { %p135_p10 = scmp.lt.s32.totalorder (!%p115_p9), %s443_s13, 1  ;;  %vm142_vm0 = vcmask (!%p115_p9), 15360   ;;  %v404_v3 = vmov (!%p115_p9), 1   ;;  %v405_v4 = vmov (!%p115_p9), 0   ;;  %v161_v14 = vlaneseq (!%p115_p9)  ;;  %v140_v18 = vld [vmem:[%s526_s1] sm:$0x3] (!%p115_p9) }
   0xe   : > { %118 = sbr.rel (%p115_p9) target bundleno = 527 (0x20f), region = 28  ;;  %328 = vset.pattern.permute.xlu1 (!%p115_p9), %v404_v3  ;;  %327 = vset.pattern.permute.xlu0 (!%p115_p9), %v405_v4  ;;  %s132_s28 = sand.u32 (!%p115_p9), 1, %s394_s10  }
   0xf   : > { %v162_v15 = vshrl.u32 (!%p115_p9), %v161_v14, 7  ;;  %s279_s29 = sshll.u32 (!%p115_p9), %s132_s28, 3  ;;  %s283_s30 = sshll.u32 (!%p115_p9), %s443_s13, 7 }
  0x10   : > { %s134_s3 = scalar_lea.vmem (!%p115_p9), [#allocation2], %s279_s29  ;;  %s483_s7 = scalar_lea.hbm (!%p115_p9), %s527_s2, %s283_s30 }
  0x11   : > { %v172_v16 = vsub.s32 (!%p115_p9), 1, %v162_v15  ;;  %v163_v17 = vsub.s32 (!%p115_p9), 0, %v162_v15  ;;  %s216_s4 = sshll.u32 (!%p115_p9), %s134_s3, 4  ;;  %s203_s8 = scalar_lea.sflag (!%p115_p9), [#allocation3], %s132_s28  ;;  %s485_s4 = int_to_ptr.vmem [resolvable:$true] %s216_s4 }
  0x12   : > { %s340_s14 = scalar_lea.vmem (!%p115_p9), %s485_s4, 128 }
  0x13   : > { %v173_v19 = vrot.slane (!%p115_p9), %v140_v18, %v172_v16  ;;  %v164_v20 = vrot.slane (!%p115_p9), %v140_v18, %v163_v17  ;;  %p341_p11 = scmp.ne.s32.totalorder (!%p115_p9), %s485_s4, %s340_s14 }
  0x15   : > { %s136_s21 = scalar_select %p135_p10, %s443_s13, 1 }
  0x16   : > { %p342_p12 = pnand %p341_p11, %p460_p5  ;;  %s406_s13 = smov [#allocation2]  }
  0x17   : > { %s280_s22 = sshll.u32 %s136_s21, 3  ;;  %s344_s16 = sshll.u32 %s406_s13, 4  ;;  %s345_s16 = int_to_ptr.vmem [resolvable:$false] %s344_s16 }
  0x18   : > { %s138_s25 = scalar_lea.vmem %s525_s0, %s280_s22  ;;  %p343_p13 = pneg %p342_p12 }
  0x19   : > { %v139_v0 = vld [vmem:[%s138_s25] sm:$0xff]  ;;  %s346_s17 = scalar_lea.vmem %s345_s16, 256  ;;  %p347_p0 = scmp.lt.s32.totalorder %s485_s4, %s345_s16 }
  0x1a   : > { %v141_v1 = vmul.f32 %v139_v0, %v139_v0  ;;  %p348_p1 = scmp.lt.s32.totalorder %s346_s17, %s340_s14 }
  0x1c   : > { %v143_v2 = vsel %vm142_vm0, %v141_v1, 0.0  ;;  %p349_p2 = por %p348_p1, %p347_p0 }
  0x1d   : > { %144 = vadd.xlane.f32.xlu0 %v143_v2 }
  0x1e   : > { %p350_p3 = pnand %p349_p2, %p343_p13 }
  0xaa   : > { %v145_v5 = vpop.xlane.xlu0 %144 }
  0xab   : > { %330 = vrsqrt.f32 %v145_v5  ;;  %vm148_vm1 = vcmp.eq.f32.partialorder %v145_v5, inf  ;;  %v151_v8 = vand.u32 2147483648, %v145_v5  ;;  %vm150_vm2 = vcmp.eq.f32.partialorder %v145_v5, 0.0 }
  0xb5   : > { %v331_v6 = vpop.eup %330 }
  0xb6   : > { %v147_v7 = vmul.f32 %v331_v6, %v145_v5 }
  0xb8   : > { %v149_v9 = vsel %vm148_vm1, %v145_v5, %v147_v7 }
  0xb9   : > { %v152_v10 = vsel %vm150_vm2, %v151_v8, %v149_v9 }
  0xba   : > { %v153_v11 = vmax.f32 %v152_v10, 1e-12 }
  0xbc   : > { %332 = vrcp.f32 %v153_v11 }
  0xc6   : > { %v333_v12 = vpop.eup %332 }
  0xc7   : > { %v155_v13 = vmul.f32 %v333_v12, %v139_v0 }
  0xc9   : > { %167 = vperm.xlu1 %328, %v155_v13   ;;  %158 = vperm.xlu0 %327, %v155_v13  }
  0xcd   : > { %329 = vset.pattern.permute.xlu0 %v404_v3 }
 0x148   : > { %v168_v21 = vpop.permute.xlu1 %167  ;;  %v159_v22 = vpop.permute.xlu0 %158 }
 0x149   : > { %v174_v23 = vmul.f32 %v173_v19, %v168_v21  ;;  %v165_v24 = vmul.f32 %v164_v20, %v159_v22 }
 0x14b   : > { %v175_v25 = vadd.f32 %v174_v23, %v165_v24 }
 0x14d   : > { %v176_v26 = vmul.f32 0.1, %v175_v25 }
 0x14f   : > { %v187_v27 = vmul.f32 10.0, %v176_v26  ;;  %v177_v30 = vmul.f32 %v176_v26, %v176_v26  ;;  %v184_v38 = vmul.f32 0.5403023, %v176_v26 }
 0x151   : > { %v188_v28 = vmul.f32 1.442695, %v187_v27  ;;  %v178_v31 = vmul.f32 0.0625, %v177_v30 }
 0x153   : > { %334 = vpow2.f32 %v188_v28  ;;  %v179_v32 = vadd.f32 0.125, %v178_v31 }
 0x155   : > { %v180_v33 = vmul.f32 %v179_v32, %v177_v30 }
 0x157   : > { %v181_v34 = vadd.f32 0.5, %v180_v33 }
 0x159   : > { %v182_v35 = vmul.f32 %v181_v34, %v177_v30 }
 0x15b   : > { %v183_v36 = vsub.f32 1.0, %v182_v35 }
 0x15d   : > { %v335_v29 = vpop.eup %334  ;;  %v185_v37 = vmul.f32 0.84147096, %v183_v36 }
 0x15e   : > { %190 = vadd.xlane.f32.xlu1 %v335_v29 }
 0x15f   : > { %v186_v39 = vsub.f32 %v184_v38, %v185_v37 }
 0x161   : > { %v194_v40 = vmul.f32 10.0, %v186_v39 }
 0x163   : > { %v195_v41 = vmul.f32 1.442695, %v194_v40 }
 0x165   : > { %336 = vpow2.f32 %v195_v41 }
 0x16f   : > { %v337_v45 = vpop.eup %336 }
 0x1eb   : > { %v191_v42 = vpop.xlane.xlu1 %190 }
 0x1ec   : > { %v281_v43 = vadd.f32 -118.0, %v191_v42 }
 0x1ee   : > { %v193_v44 = vsub.f32 %v281_v43, %v335_v29 }
 0x1f0   : > { %v197_v46 = vadd.f32 %v337_v45, %v193_v44 }
 0x1f2   : > { %338 = vlog2.f32 %v197_v46 }
 0x1fc   : > { %v339_v47 = vpop.eup %338 }
 0x1fd   : > { %v199_v48 = vmul.f32 0.6931472, %v339_v47 }
 0x1ff   : > { %v200_v49 = vsub.f32 %v194_v40, %v199_v48 }
 0x201   : > { %201 = vst [vmem:[%s134_s3] sm:$0xff] %v200_v49 }
 0x202   : > { %353 = shalt.err (!%p350_p3)
}
 0x203   : > { %s354_s21 = scalar_lea.hbm %s483_s7, 128  ;;  %s358_s24 = scalar_lea.hbm %s527_s2, 256 }
 0x204   : > { %p355_p4 = scmp.ne.s32.totalorder %s483_s7, %s354_s21  ;;  %p359_p9 = scmp.lt.u32.totalorder %s483_s7, %s527_s2 }
 0x205   : > { %p360_p10 = scmp.lt.u32.totalorder %s358_s24, %s354_s21  ;;  %p362_p12 = scmp.lt.u32.totalorder %s354_s21, %s483_s7 }
 0x206   : > { %p356_p7 = pnand %p355_p4, %p460_p5 }
 0x207   : > { %p361_p11 = por %p360_p10, %p359_p9 }
 0x208   : > { %p357_p8 = pneg %p356_p7 }
 0x209   : > { %p363_p13 = por %p362_p12, %p361_p11 }
 0x20b   : > { %p364_p0 = pnand %p363_p13, %p357_p8 }
 0x20d   : > { %367 = shalt.err (!%p364_p0)
}
 0x20e   : > { %286 = dma.vmem_to_hbm [thread:$0]  (%p460_p5), %s485_s4, 128, %s483_s7, %s203_s8  }
 0x20f PF: > { %p292_p1 = scmp.ge.s32.totalorder %s402_s12, 2  ;;  %s228_s27 = sand.u32 1, %s390_s9  }
 0x210   : > { %s229_s28 = scalar_lea.sflag [#allocation3], %s228_s27 }
 0x211   : > { %p289_p2 = pnand %p292_p1, %p464_p6 }
 0x213   : > { %385 = dma.done.wait (!%p289_p2), %s229_s28, 128  }
 0x214   : > { %387 = vsyncadd (!%p289_p2), %s229_s28, 4294967168  ;;  %p12_p3 = scmp.ge.s32.totalorder %s447_s15, 4   ;;  %s530_s9 = smov %s394_s10 }
 0x215   : > { %s531_s10 = smov %s398_s11  ;;  %s532_s11 = smov %s458_s18 }
 0x216   : > { %s533_s12 = smov %s447_s15  ;;  %14 = sbr.rel (!%p12_p3) target bundleno = 3 (0x3), region = 63 }
 0x21d   :  { %234 = vsyncpa [#allocation3], 1 }
 0x21e   :  { %236 = vsyncpa [#allocation3 + $0x1], 1 }

</bundles_post_ra>
